<compile_context>
chip_gen: v6e
topology: v6e:2x2x1
jax: 0.10.0
libtpu: 0.0.40
codegen_flags: <defaults>
</compile_context>

<pallas_src>
import functools
import operator

import jax
import jax.numpy as jnp
from jax.experimental import pallas as pl
from jax.experimental.pallas import tpu as pltpu


# --------------------------------------------------------------------------
# Kernels
# --------------------------------------------------------------------------
def _linear_kernel(x_ref, w_ref, b_ref, o_ref):
    # x: (tile_m, K), w: (K, N) canonical MXU layout, b: (1, N).
    acc = jax.lax.dot_general(
        x_ref[...], w_ref[...],
        dimension_numbers=(((1,), (0,)), ((), ())),
        preferred_element_type=jnp.float32,
    )
    o_ref[...] = (acc + b_ref[...]).astype(o_ref.dtype)


def _linear_kernel_ksplit(x_ref, w_ref, b_ref, o_ref, acc_ref):
    # Streams the weight along K; f32 accumulator in VMEM scratch.
    kk = pl.program_id(1)

    @pl.when(kk == 0)
    def _():
        acc_ref[...] = jnp.zeros_like(acc_ref)

    acc_ref[...] += jax.lax.dot_general(
        x_ref[...], w_ref[...],
        dimension_numbers=(((1,), (0,)), ((), ())),
        preferred_element_type=jnp.float32,
    )

    @pl.when(kk == pl.num_programs(1) - 1)
    def _():
        o_ref[...] = (acc_ref[...] + b_ref[...]).astype(o_ref.dtype)


# --------------------------------------------------------------------------
# VMEM sizing helpers ((8, 128)-tiled layout aware, generation aware)
# --------------------------------------------------------------------------
def _round_up(v, mult):
    return ((v + mult - 1) // mult) * mult


def _buf_bytes(rows, cols, itemsize):
    """Bytes of one (rows, cols) VMEM buffer under the (8, 128) tiled layout.

    Sub-32-bit dtypes pack along sublanes, so the sublane multiple scales."""
    sub = 8 * max(1, 4 // max(1, itemsize))
    return _round_up(max(1, rows), sub) * _round_up(max(1, cols), 128) * itemsize


def _vmem_capacity_bytes():
    try:
        cap = getattr(pltpu.get_tpu_info(), "vmem_capacity_bytes", None)
        if cap:
            return int(cap)
    except Exception:
        pass
    return 64 * 1024 * 1024  # conservative default (v7x per-TC VMEM)


def _pick_tile_m(m, x_cols, n, itemsize, budget, resident_bytes, acc_f32):
    """Largest multiple-of-8 M tile whose (8,128)-tiled buffers fit `budget`."""
    per8 = 2 * _buf_bytes(8, x_cols, itemsize) + 2 * _buf_bytes(8, n, itemsize)
    if acc_f32:
        per8 += _buf_bytes(8, n, 4)
    avail = max(budget - resident_bytes, per8)
    tile = (avail // per8) * 8
    return max(8, min(int(tile), 1024, _round_up(m, 8)))


def _choose_tile_k(k, n, itemsize, budget):
    """Largest multiple-of-128 divisor of k whose double-buffered weight slab
    fits half the budget; None if no usable split exists."""
    best = None
    tk = 128
    while tk < k:
        if k % tk == 0 and 2 * _buf_bytes(tk, n, itemsize) <= budget // 2:
            best = tk
        tk += 128
    return best


# --------------------------------------------------------------------------
# Forward paths
# --------------------------------------------------------------------------
def _forward_resident(x2, w_t, bias2, m, in_dim, embed_dim, budget, vmem_limit,
                      cost, tile_m, out_dtype):
    itemsize = x2.dtype.itemsize

    def run(single_buffer):
        n_bufs = 1 if single_buffer else 2
        resident = n_bufs * (_buf_bytes(in_dim, embed_dim, itemsize)
                             + _buf_bytes(1, embed_dim, itemsize))
        tm = tile_m if tile_m is not None else _pick_tile_m(
            m, in_dim, embed_dim, itemsize, budget, resident, acc_f32=False)
        tm = max(8, _round_up(tm, 8))
        res_kwargs = {"pipeline_mode": pl.Buffered(1)} if single_buffer else {}
        return pl.pallas_call(
            _linear_kernel,
            out_shape=jax.ShapeDtypeStruct((m, embed_dim), out_dtype),
            grid=(pl.cdiv(m, tm),),
            in_specs=[
                # x tiles stream through VMEM (double-buffered).
                pl.BlockSpec((tm, in_dim), lambda i: (i, 0)),
                # weight / bias stay resident across all grid steps.
                pl.BlockSpec((in_dim, embed_dim), lambda i: (0, 0), **res_kwargs),
                pl.BlockSpec((1, embed_dim), lambda i: (0, 0), **res_kwargs),
            ],
            out_specs=pl.BlockSpec((tm, embed_dim), lambda i: (i, 0)),
            compiler_params=pltpu.CompilerParams(
                # TODO(synk): on v7x, profile and switch to pltpu.CORE_PARALLEL
                # if the M tiles do not shard across the two TensorCores.
                dimension_semantics=("parallel",),
                vmem_limit_bytes=vmem_limit),
            cost_estimate=cost,
        )(x2, w_t, bias2)

    try:
        return run(True)
    except Exception:
        # pl.Buffered(1) not accepted by this jax build -> default buffering.
        return run(False)


def _forward_ksplit(x2, w_t, bias2, m, in_dim, embed_dim, tile_k, budget,
                    vmem_limit, cost, tile_m, out_dtype):
    itemsize = x2.dtype.itemsize
    resident = (2 * _buf_bytes(tile_k, embed_dim, itemsize)
                + 2 * _buf_bytes(1, embed_dim, itemsize))
    tm = tile_m if tile_m is not None else _pick_tile_m(
        m, tile_k, embed_dim, itemsize, budget, resident, acc_f32=True)
    tm = max(8, _round_up(tm, 8))
    return pl.pallas_call(
        _linear_kernel_ksplit,
        out_shape=jax.ShapeDtypeStruct((m, embed_dim), out_dtype),
        grid=(pl.cdiv(m, tm), in_dim // tile_k),   # K axis last (reduction)
        in_specs=[
            pl.BlockSpec((tm, tile_k), lambda i, kk: (i, kk)),
            pl.BlockSpec((tile_k, embed_dim), lambda i, kk: (kk, 0)),
            pl.BlockSpec((1, embed_dim), lambda i, kk: (0, 0)),
        ],
        out_specs=pl.BlockSpec((tm, embed_dim), lambda i, kk: (i, 0)),
        scratch_shapes=[pltpu.VMEM((tm, embed_dim), jnp.float32)],
        compiler_params=pltpu.CompilerParams(
            dimension_semantics=("parallel", "arbitrary"),
            vmem_limit_bytes=vmem_limit),
        cost_estimate=cost,
    )(x2, w_t, bias2)


# --------------------------------------------------------------------------
# Public wrapper (torch.nn.Linear forward semantics)
# --------------------------------------------------------------------------
def input_embedding(x, weight, bias, *, tile_m=None, tile_k=None):
    """y = x @ weight.T + bias.

    x:      (..., input_dim)
    weight: (embed_dim, input_dim)   (PyTorch convention)
    bias:   (embed_dim,)
    returns (..., embed_dim)
    """
    in_dim = x.shape[-1]
    embed_dim = weight.shape[0]
    lead = x.shape[:-1]
    m = functools.reduce(operator.mul, lead, 1)
    itemsize = x.dtype.itemsize

    # One-time canonicalization (in production: store the weight pre-transposed
    # at init instead of transposing per call).
    w_t = weight.T                          # (in_dim, embed_dim), MXU-native
    bias2 = bias.reshape(1, embed_dim)
    x2 = x.reshape(m, in_dim)

    # Generation-aware VMEM budget / explicit scoped-VMEM limit.
    cap = _vmem_capacity_bytes()
    budget = min(cap // 4, 32 * 1024 * 1024)
    vmem_limit = min(cap // 2, 64 * 1024 * 1024)

    cost = pl.CostEstimate(
        flops=2 * m * in_dim * embed_dim,
        transcendentals=0,
        bytes_accessed=(m * in_dim + in_dim * embed_dim + embed_dim
                        + m * embed_dim) * itemsize,
    )

    # Decide whether the weight can stay fully VMEM-resident.
    w_resident_bytes = (_buf_bytes(in_dim, embed_dim, itemsize)
                        + _buf_bytes(1, embed_dim, itemsize))
    if tile_k is None and w_resident_bytes > budget // 2:
        tile_k = _choose_tile_k(in_dim, embed_dim, itemsize, budget)
        # TODO(synk): if in_dim has no multiple-of-128 divisor (or embed_dim is
        # so large that even tile_k=128 doesn't fit), an N grid axis would be
        # needed; until then we fall back to the resident path.

    if (tile_k is not None and tile_k % 128 == 0 and tile_k < in_dim
            and in_dim % tile_k == 0):
        out = _forward_ksplit(x2, w_t, bias2, m, in_dim, embed_dim, tile_k,
                              budget, vmem_limit, cost, tile_m, x.dtype)
    else:
        out = _forward_resident(x2, w_t, bias2, m, in_dim, embed_dim, budget,
                                vmem_limit, cost, tile_m, x.dtype)

    return out.reshape(*lead, embed_dim)


# --------------------------------------------------------------------------
# Self-test
# --------------------------------------------------------------------------
if __name__ == "__main__":
    def make(batch, seq, input_dim, embed_dim, k):
        kx, kw, kb = jax.random.split(k, 3)
        x = jax.random.normal(kx, (batch, seq, input_dim), dtype=jnp.float32)
        bound = 1.0 / (input_dim ** 0.5)     # nn.Linear default init range
        w = jax.random.uniform(kw, (embed_dim, input_dim),
                               minval=-bound, maxval=bound, dtype=jnp.float32)
        b = jax.random.uniform(kb, (embed_dim,),
                               minval=-bound, maxval=bound, dtype=jnp.float32)
        return x, w, b

    k1, k2, k3 = jax.random.split(jax.random.PRNGKey(0), 3)

    # 1) Module-sized shapes: (batch=2, seq=8, input_dim=16) -> embed_dim=32.
    x, w, b = make(2, 8, 16, 32, k1)
    y = jax.block_until_ready(input_embedding(x, w, b))
    y_ref = x @ w.T + b
    assert y.shape == (2, 8, 32)
    assert jnp.allclose(y, y_ref, atol=1e-5, rtol=1e-5)

    # 2) Non-divisible M (m=30, tile_m=8): ragged last block, no HBM padding.
    x, w, b = make(3, 10, 16, 32, k2)
    y = jax.block_until_ready(input_embedding(x, w, b, tile_m=8))
    y_ref = x @ w.T + b
    assert y.shape == (3, 10, 32)
    assert jnp.allclose(y, y_ref, atol=1e-5, rtol=1e-5)

    # 3) K-streaming path (in_dim=256 split into tile_k=128 chunks).
    x, w, b = make(2, 8, 256, 128, k3)
    y = jax.block_until_ready(input_embedding(x, w, b, tile_k=128))
    y_ref = x @ w.T + b
    assert y.shape == (2, 8, 128)
    assert jnp.allclose(y, y_ref, atol=1e-4, rtol=1e-4)

    print("KERNEL_OK")
</pallas_src>

<mosaic_0001>
module attributes {stable_mosaic.version = 11 : i64} {
  func.func @_linear_kernel(%arg0: i32, %arg1: memref<16x16xf32, #tpu.memory_space<vmem>>, %arg2: memref<16x32xf32, #tpu.memory_space<vmem>>, %arg3: memref<1x32xf32, #tpu.memory_space<vmem>>, %arg4: memref<16x32xf32, #tpu.memory_space<vmem>>) attributes {dimension_semantics = [#tpu.dimension_semantics<parallel>], iteration_bounds = array<i64: 1>, scalar_prefetch = 0 : i64, scratch_operands = 0 : i64, tpu.core_type = #tpu.core_type<tc>, window_params = [{transform_indices = @transform_0, window_bounds = array<i64: 16, 16>}, {pipeline_mode = #tpu.pipeline_mode<synchronous>, transform_indices = @transform_1, window_bounds = array<i64: 16, 32>}, {pipeline_mode = #tpu.pipeline_mode<synchronous>, transform_indices = @transform_2, window_bounds = array<i64: 1, 32>}, {transform_indices = @transform_3, window_bounds = array<i64: 16, 32>}]} {
    %c0 = arith.constant 0 : index
    %c0_0 = arith.constant 0 : index
    %0 = vector.load %arg1[%c0, %c0_0] : memref<16x16xf32, #tpu.memory_space<vmem>>, vector<16x16xf32>
    %c0_1 = arith.constant 0 : index
    %c0_2 = arith.constant 0 : index
    %1 = vector.load %arg2[%c0_1, %c0_2] : memref<16x32xf32, #tpu.memory_space<vmem>>, vector<16x32xf32>
    %cst = arith.constant dense<0.000000e+00> : vector<16x32xf32>
    %2 = tpu.matmul %0, %1, %cst {dimension_numbers = #tpu.dot_dimension_numbers<[1], [0], [0], [1], [0, 0, 1, 1], [], []>} : vector<16x16xf32>, vector<16x32xf32>, vector<16x32xf32> -> vector<16x32xf32>
    %c0_3 = arith.constant 0 : index
    %c0_4 = arith.constant 0 : index
    %3 = vector.load %arg3[%c0_3, %c0_4] : memref<1x32xf32, #tpu.memory_space<vmem>>, vector<1x32xf32>
    %4 = vector.broadcast %3 : vector<1x32xf32> to vector<16x32xf32>
    %5 = arith.addf %2, %4 : vector<16x32xf32>
    %c0_5 = arith.constant 0 : index
    %c0_6 = arith.constant 0 : index
    %6 = vector.load %arg4[%c0_5, %c0_6] : memref<16x32xf32, #tpu.memory_space<vmem>>, vector<16x32xf32>
    tpu.vector_store %arg4[%c0_5, %c0_6], %5 {strides = array<i32>} : memref<16x32xf32, #tpu.memory_space<vmem>>, vector<16x32xf32>,
    return
  }
  func.func @transform_0(%arg0: i32) -> (i32, i32) {
    %c0_i32 = arith.constant 0 : i32
    %c0_i32_0 = arith.constant 0 : i32
    return %arg0, %c0_i32 : i32, i32
  }
  func.func @transform_1(%arg0: i32) -> (i32, i32) {
    %c0_i32 = arith.constant 0 : i32
    %c0_i32_0 = arith.constant 0 : i32
    %c0_i32_1 = arith.constant 0 : i32
    return %c0_i32, %c0_i32_0 : i32, i32
  }
  func.func @transform_2(%arg0: i32) -> (i32, i32) {
    %c0_i32 = arith.constant 0 : i32
    %c0_i32_0 = arith.constant 0 : i32
    %c0_i32_1 = arith.constant 0 : i32
    return %c0_i32, %c0_i32_0 : i32, i32
  }
  func.func @transform_3(%arg0: i32) -> (i32, i32) {
    %c0_i32 = arith.constant 0 : i32
    %c0_i32_0 = arith.constant 0 : i32
    return %arg0, %c0_i32 : i32, i32
  }
}

module attributes {stable_mosaic.version = 11 : i64} {
  func.func @_linear_kernel(%arg0: i32, %arg1: memref<16x16xf32, #tpu.memory_space<vmem>>, %arg2: memref<16x32xf32, #tpu.memory_space<vmem>>, %arg3: memref<1x32xf32, #tpu.memory_space<vmem>>, %arg4: memref<16x32xf32, #tpu.memory_space<vmem>>) attributes {dimension_semantics = [#tpu.dimension_semantics<parallel>], iteration_bounds = array<i64: 1>, scalar_prefetch = 0 : i64, scratch_operands = 0 : i64, tpu.core_type = #tpu.core_type<tc>, window_params = [{transform_indices = @transform_0, window_bounds = array<i64: 16, 16>}, {pipeline_mode = #tpu.pipeline_mode<synchronous>, transform_indices = @transform_1, window_bounds = array<i64: 16, 32>}, {pipeline_mode = #tpu.pipeline_mode<synchronous>, transform_indices = @transform_2, window_bounds = array<i64: 1, 32>}, {transform_indices = @transform_3, window_bounds = array<i64: 16, 32>}]} {
    %c0 = arith.constant 0 : index
    %c0_0 = arith.constant 0 : index
    %0 = vector.load %arg1[%c0, %c0_0] : memref<16x16xf32, #tpu.memory_space<vmem>>, vector<16x16xf32>
    %c0_1 = arith.constant 0 : index
    %c0_2 = arith.constant 0 : index
    %1 = vector.load %arg2[%c0_1, %c0_2] : memref<16x32xf32, #tpu.memory_space<vmem>>, vector<16x32xf32>
    %cst = arith.constant dense<0.000000e+00> : vector<16x32xf32>
    %2 = tpu.matmul %0, %1, %cst {dimension_numbers = #tpu.dot_dimension_numbers<[1], [0], [0], [1], [0, 0, 1, 1], [], []>} : vector<16x16xf32>, vector<16x32xf32>, vector<16x32xf32> -> vector<16x32xf32>
    %c0_3 = arith.constant 0 : index
    %c0_4 = arith.constant 0 : index
    %3 = vector.load %arg3[%c0_3, %c0_4] : memref<1x32xf32, #tpu.memory_space<vmem>>, vector<1x32xf32>
    %4 = vector.broadcast %3 : vector<1x32xf32> to vector<16x32xf32>
    %5 = arith.addf %2, %4 : vector<16x32xf32>
    %c0_5 = arith.constant 0 : index
    %c0_6 = arith.constant 0 : index
    %6 = vector.load %arg4[%c0_5, %c0_6] : memref<16x32xf32, #tpu.memory_space<vmem>>, vector<16x32xf32>
    tpu.vector_store %arg4[%c0_5, %c0_6], %5 {strides = array<i32>} : memref<16x32xf32, #tpu.memory_space<vmem>>, vector<16x32xf32>,
    return
  }
  func.func @transform_0(%arg0: i32) -> (i32, i32) {
    %c0_i32 = arith.constant 0 : i32
    %c0_i32_0 = arith.constant 0 : i32
    return %arg0, %c0_i32 : i32, i32
  }
  func.func @transform_1(%arg0: i32) -> (i32, i32) {
    %c0_i32 = arith.constant 0 : i32
    %c0_i32_0 = arith.constant 0 : i32
    %c0_i32_1 = arith.constant 0 : i32
    return %c0_i32, %c0_i32_0 : i32, i32
  }
  func.func @transform_2(%arg0: i32) -> (i32, i32) {
    %c0_i32 = arith.constant 0 : i32
    %c0_i32_0 = arith.constant 0 : i32
    %c0_i32_1 = arith.constant 0 : i32
    return %c0_i32, %c0_i32_0 : i32, i32
  }
  func.func @transform_3(%arg0: i32) -> (i32, i32) {
    %c0_i32 = arith.constant 0 : i32
    %c0_i32_0 = arith.constant 0 : i32
    return %arg0, %c0_i32 : i32, i32
  }
}

</mosaic_0001>

<bundles_post_ra>
// kernel: tpu_custom_call.1
= control target key start
LH: loop header
LB: loop body
LE: loop exit
PB: predicated region body
PF: predicated region fallthrough
CT: control target
= control target key end

     0   :  { %8 = vsyncpa [#allocation3], 0  ;;  %s288_s0 = inlined_call_operand.hbm [shape: f32[16,16], index: 0, kind: input, shape index: {}]   ;;  %s289_s1 = inlined_call_operand.hbm [shape: f32[16,32], index: 1, kind: input, shape index: {}]   ;;  %s290_s2 = inlined_call_operand.vmem [shape: f32[1,32], index: 2, kind: input, shape index: {}]   ;;  %s291_s3 = inlined_call_operand.hbm [shape: f32[16,32], index: 3, kind: output, shape index: {}]  }
   0x1   :  { %9 = vsyncpa [#allocation6], 0 }
   0x2   :  { %10 = vsyncpa [#allocation4], 0  ;;  %s242_s12 = smov [#allocation2]  }
   0x3   :  { %s16_s13 = sshll.u32 %s242_s12, 4  ;;  %s17_s13 = int_to_ptr.vmem [resolvable:$true] %s16_s13 }
   0x4   :  { %s184_s14 = scalar_lea.vmem %s17_s13, 256  ;;  %p189_p1 = scmp.lt.s32.totalorder %s17_s13, %s17_s13 }
   0x5   :  { %p185_p0 = scmp.ne.s32.totalorder %s17_s13, %s184_s14  ;;  %p190_p2 = scmp.lt.s32.totalorder %s184_s14, %s184_s14 }
   0x7   :  { %p191_p3 = por %p190_p2, %p189_p1 }
   0x9   :  { %p192_p4 = pnand %p191_p3, %p185_p0 }
   0xb   :  { %195 = shalt.err (!%p192_p4)
}
   0xc   :  { %s243_s15 = smov 128   ;;  %s244_s16 = smov 8  }
   0xd   :  { %22 = dma.hbm_to_vmem [thread:$0]  %s288_s0, 256, %s17_s13, [#allocation3], %s243_s15, %s243_s15, %s244_s16  }
   0xe   :  { %s245_s19 = smov [#allocation5]  }
   0xf   :  { %s28_s20 = sshll.u32 %s245_s19, 4  ;;  %s29_s20 = int_to_ptr.vmem [resolvable:$true] %s28_s20 }
  0x10   :  { %s204_s21 = scalar_lea.vmem %s29_s20, 256  ;;  %p209_p6 = scmp.lt.s32.totalorder %s29_s20, %s29_s20 }
  0x11   :  { %p205_p5 = scmp.ne.s32.totalorder %s29_s20, %s204_s21  ;;  %p210_p7 = scmp.lt.s32.totalorder %s204_s21, %s204_s21 }
  0x13   :  { %p211_p8 = por %p210_p7, %p209_p6 }
  0x15   :  { %p212_p9 = pnand %p211_p8, %p205_p5 }
  0x17   :  { %215 = shalt.err (!%p212_p9)
}
  0x18   :  { %34 = dma.hbm_to_vmem [thread:$0]  %s289_s1, 256, %s29_s20, [#allocation6], %s243_s15, %s243_s15, %s244_s16  }
  0x19   :  { %236 = dma.done.wait [#allocation3], 256  }
  0x1a   :  { %237 = vsyncadd [#allocation3], 4294967040 }
  0x1b   :  { %238 = dma.done.wait [#allocation6], 256  }
  0x1c   :  { %239 = vsyncadd [#allocation6], 4294967040  ;;  %vm54_vm0 = vcmask 130048   ;;  %v46_v0 = vld [vmem:[#allocation5 + $0x8] sm:$0xff]  ;;  %v45_v1 = vld [vmem:[#allocation5] sm:$0xff]  ;;  %vm136_vm1 = vcmask 261120  }
  0x1d   :  { %v43_v2 = vld [vmem:[#allocation2] sm:$0xff]  ;;  %164 = vmatprep.subr.mxu0 %v46_v0  ;;  %v44_v3 = vld [vmem:[#allocation2 + $0x8] sm:$0xff]  ;;  %s246_s1 = smov [#allocation7]  }
  0x1e   :  { %168 = vmatprep.mubr.msk.f32.mxu0 %vm54_vm0, %v43_v2  ;;  %165 = vmatpush3.msra.mxu0 %v46_v0  ;;  %v157_v4 = vld [vmem:[%s290_s2] ss:$0 sm:$0xff]  ;;  %s144_s25 = sshll.u32 %s246_s1, 4  ;;  %s145_s25 = int_to_ptr.vmem [resolvable:$true] %s144_s25 }
  0x1f   :  { %166 = vmatprep.subr.mxu0 %v45_v1  ;;  %s216_s26 = scalar_lea.vmem %s145_s25, 256  ;;  %p221_p11 = scmp.lt.s32.totalorder %s145_s25, %s145_s25 }
  0x20   :  { %167 = vmatpush3.msra.mxu0 %v45_v1  ;;  %p217_p10 = scmp.ne.s32.totalorder %s145_s25, %s216_s26  ;;  %p222_p12 = scmp.lt.s32.totalorder %s216_s26, %s216_s26 }
  0x21   :  { %169 = vmatmul.mubr.msk.f32.vlgmr.msra.gmra.mxu0 %vm54_vm0, %v44_v3 }
  0x22   :  { %p223_p13 = por %p222_p12, %p221_p11 }
  0x24   :  { %p224_p0 = pnand %p223_p13, %p217_p10 }
  0xe1   :  { %v170_v5 = vpop.f32.mrf.mxu0 }
  0xe2   :  { %v133_v6 = vadd.f32 %v170_v5, %v157_v4 }
  0xe3   :  { %v127_v7 = vpop.f32.mrf.mxu0 }
  0xe4   :  { %v128_v8 = vadd.f32 %v157_v4, %v127_v7  ;;  %138 = vst.msk [vmem:[#allocation7 + $0x8] sm:$0xff] %vm136_vm1, %v133_v6 }
  0xe6   :  { %137 = vst.msk [vmem:[#allocation7] sm:$0xff] %vm136_vm1, %v128_v8 }
  0xe7   :  { %227 = shalt.err (!%p224_p0)
}
  0xe8   :  { %150 = dma.vmem_to_hbm [thread:$0]  %s145_s25, 256, %s291_s3, [#allocation4], %s243_s15, %s243_s15, %s244_s16  }
  0xe9   :  { %240 = dma.done.wait [#allocation4], 256  }
  0xea   :  { %241 = vsyncadd [#allocation4], 4294967040 }
  0xeb   :  { %154 = vsyncpa [#allocation3], 1 }
  0xec   :  { %155 = vsyncpa [#allocation6], 1 }
  0xed   :  { %156 = vsyncpa [#allocation4], 1 }

// kernel: tpu_custom_call.1
= control target key start
LH: loop header
LB: loop body
LE: loop exit
PB: predicated region body
PF: predicated region fallthrough
CT: control target
= control target key end

     0   :  { %8 = vsyncpa [#allocation3], 0  ;;  %s288_s0 = inlined_call_operand.hbm [shape: f32[16,16], index: 0, kind: input, shape index: {}]   ;;  %s289_s1 = inlined_call_operand.hbm [shape: f32[16,32], index: 1, kind: input, shape index: {}]   ;;  %s290_s2 = inlined_call_operand.vmem [shape: f32[1,32], index: 2, kind: input, shape index: {}]   ;;  %s291_s3 = inlined_call_operand.hbm [shape: f32[16,32], index: 3, kind: output, shape index: {}]  }
   0x1   :  { %9 = vsyncpa [#allocation6], 0 }
   0x2   :  { %10 = vsyncpa [#allocation4], 0  ;;  %s242_s12 = smov [#allocation2]  }
   0x3   :  { %s16_s13 = sshll.u32 %s242_s12, 4  ;;  %s17_s13 = int_to_ptr.vmem [resolvable:$true] %s16_s13 }
   0x4   :  { %s184_s14 = scalar_lea.vmem %s17_s13, 256  ;;  %p189_p1 = scmp.lt.s32.totalorder %s17_s13, %s17_s13 }
   0x5   :  { %p185_p0 = scmp.ne.s32.totalorder %s17_s13, %s184_s14  ;;  %p190_p2 = scmp.lt.s32.totalorder %s184_s14, %s184_s14 }
   0x7   :  { %p191_p3 = por %p190_p2, %p189_p1 }
   0x9   :  { %p192_p4 = pnand %p191_p3, %p185_p0 }
   0xb   :  { %195 = shalt.err (!%p192_p4)
}
   0xc   :  { %s243_s15 = smov 128   ;;  %s244_s16 = smov 8  }
   0xd   :  { %22 = dma.hbm_to_vmem [thread:$0]  %s288_s0, 256, %s17_s13, [#allocation3], %s243_s15, %s243_s15, %s244_s16  }
   0xe   :  { %s245_s19 = smov [#allocation5]  }
   0xf   :  { %s28_s20 = sshll.u32 %s245_s19, 4  ;;  %s29_s20 = int_to_ptr.vmem [resolvable:$true] %s28_s20 }
  0x10   :  { %s204_s21 = scalar_lea.vmem %s29_s20, 256  ;;  %p209_p6 = scmp.lt.s32.totalorder %s29_s20, %s29_s20 }
  0x11   :  { %p205_p5 = scmp.ne.s32.totalorder %s29_s20, %s204_s21  ;;  %p210_p7 = scmp.lt.s32.totalorder %s204_s21, %s204_s21 }
  0x13   :  { %p211_p8 = por %p210_p7, %p209_p6 }
  0x15   :  { %p212_p9 = pnand %p211_p8, %p205_p5 }
  0x17   :  { %215 = shalt.err (!%p212_p9)
}
  0x18   :  { %34 = dma.hbm_to_vmem [thread:$0]  %s289_s1, 256, %s29_s20, [#allocation6], %s243_s15, %s243_s15, %s244_s16  }
  0x19   :  { %236 = dma.done.wait [#allocation3], 256  }
  0x1a   :  { %237 = vsyncadd [#allocation3], 4294967040 }
  0x1b   :  { %238 = dma.done.wait [#allocation6], 256  }
  0x1c   :  { %239 = vsyncadd [#allocation6], 4294967040  ;;  %vm54_vm0 = vcmask 130048   ;;  %v46_v0 = vld [vmem:[#allocation5 + $0x8] sm:$0xff]  ;;  %v45_v1 = vld [vmem:[#allocation5] sm:$0xff]  ;;  %vm136_vm1 = vcmask 261120  }
  0x1d   :  { %v43_v2 = vld [vmem:[#allocation2] sm:$0xff]  ;;  %164 = vmatprep.subr.mxu0 %v46_v0  ;;  %v44_v3 = vld [vmem:[#allocation2 + $0x8] sm:$0xff]  ;;  %s246_s1 = smov [#allocation7]  }
  0x1e   :  { %168 = vmatprep.mubr.msk.f32.mxu0 %vm54_vm0, %v43_v2  ;;  %165 = vmatpush3.msra.mxu0 %v46_v0  ;;  %v157_v4 = vld [vmem:[%s290_s2] ss:$0 sm:$0xff]  ;;  %s144_s25 = sshll.u32 %s246_s1, 4  ;;  %s145_s25 = int_to_ptr.vmem [resolvable:$true] %s144_s25 }
  0x1f   :  { %166 = vmatprep.subr.mxu0 %v45_v1  ;;  %s216_s26 = scalar_lea.vmem %s145_s25, 256  ;;  %p221_p11 = scmp.lt.s32.totalorder %s145_s25, %s145_s25 }
  0x20   :  { %167 = vmatpush3.msra.mxu0 %v45_v1  ;;  %p217_p10 = scmp.ne.s32.totalorder %s145_s25, %s216_s26  ;;  %p222_p12 = scmp.lt.s32.totalorder %s216_s26, %s216_s26 }
  0x21   :  { %169 = vmatmul.mubr.msk.f32.vlgmr.msra.gmra.mxu0 %vm54_vm0, %v44_v3 }
  0x22   :  { %p223_p13 = por %p222_p12, %p221_p11 }
  0x24   :  { %p224_p0 = pnand %p223_p13, %p217_p10 }
  0xe1   :  { %v170_v5 = vpop.f32.mrf.mxu0 }
  0xe2   :  { %v133_v6 = vadd.f32 %v170_v5, %v157_v4 }
  0xe3   :  { %v127_v7 = vpop.f32.mrf.mxu0 }
  0xe4   :  { %v128_v8 = vadd.f32 %v157_v4, %v127_v7  ;;  %138 = vst.msk [vmem:[#allocation7 + $0x8] sm:$0xff] %vm136_vm1, %v133_v6 }
  0xe6   :  { %137 = vst.msk [vmem:[#allocation7] sm:$0xff] %vm136_vm1, %v128_v8 }
  0xe7   :  { %227 = shalt.err (!%p224_p0)
}
  0xe8   :  { %150 = dma.vmem_to_hbm [thread:$0]  %s145_s25, 256, %s291_s3, [#allocation4], %s243_s15, %s243_s15, %s244_s16  }
  0xe9   :  { %240 = dma.done.wait [#allocation4], 256  }
  0xea   :  { %241 = vsyncadd [#allocation4], 4294967040 }
  0xeb   :  { %154 = vsyncpa [#allocation3], 1 }
  0xec   :  { %155 = vsyncpa [#allocation6], 1 }
  0xed   :  { %156 = vsyncpa [#allocation4], 1 }

</bundles_post_ra>
